<compile_context>
chip_gen: v5e
topology: v5e:2x2
jax: 0.10.0
libtpu: 0.0.40
codegen_flags: <defaults>
</compile_context>

<pallas_src>
import functools

import jax
import jax.numpy as jnp
from jax import lax
from jax.experimental import pallas as pl
from jax.experimental.pallas import tpu as pltpu


MINER_MARGIN = 0.2
MS_ALPHA = 1.0
MS_BETA = 60.0
MS_BASE = 0.5


def _round_up(x, m):
    return (x + m - 1) // m * m


def _compiler_params(vmem_est_bytes, *dims):
    # Explicit scoped-VMEM limit sized to the working set (with headroom), capped at the
    # smallest per-TC VMEM across generations (v7x: 64 MiB).
    limit = int(min(max(2 * vmem_est_bytes, 32 * 2**20), 64 * 2**20))
    return pltpu.CompilerParams(dimension_semantics=dims, vmem_limit_bytes=limit)


# ----------------------------------------------------------------------------------
# Kernel 1a ('cls'): synthetic encoder (dense + tanh) on the CLS rows of both views,
# fused into one row-tiled matmul over 2N rows. W is a resident bf16 operand
# (single-buffered); x is cast to bf16 in-register (autocast-style) so the DMA stays
# a single f32 pass.
# ----------------------------------------------------------------------------------
def _dense_tanh_rows_kernel(x_ref, w_ref, b_ref, out_ref):
    x = x_ref[...].astype(jnp.bfloat16)                 # (TR, H)
    w = w_ref[...]                                      # (H, H) bf16, resident
    b = b_ref[...]                                      # (1, H) f32
    z = jnp.dot(x, w, preferred_element_type=jnp.float32) + b
    out_ref[...] = jnp.tanh(z)                          # lane-dense (TR, H) store


def encode_cls_rows(rows, w_bf16, b, *, tile_rows=256):
    r, h = rows.shape
    tr = min(tile_rows, _round_up(r, 8))
    r_pad = _round_up(r, tr)
    if r_pad != r:
        rows = jnp.pad(rows, ((0, r_pad - r), (0, 0)))
    est = 2 * tr * h * 4 + h * h * 2 + h * 4 + 2 * tr * h * 4
    out = pl.pallas_call(
        _dense_tanh_rows_kernel,
        out_shape=jax.ShapeDtypeStruct((r_pad, h), jnp.float32),
        grid_spec=pltpu.PrefetchScalarGridSpec(
            num_scalar_prefetch=0,
            grid=(r_pad // tr,),
            in_specs=[
                pl.BlockSpec((tr, h), lambda i: (i, 0)),
                pl.BlockSpec((h, h), lambda i: (0, 0), pipeline_mode=pl.Buffered(1)),
                pl.BlockSpec((1, h), lambda i: (0, 0), pipeline_mode=pl.Buffered(1)),
            ],
            out_specs=pl.BlockSpec((tr, h), lambda i: (i, 0)),
        ),
        compiler_params=_compiler_params(est, "parallel"),
    )(rows, w_bf16, b.reshape(1, h))
    return out[:r]


# ----------------------------------------------------------------------------------
# Kernel 1b ('mean' / 'mean_all_tok'): dense + tanh over all tokens of a tile of
# examples (flattened into one matmul) fused with weighted pooling. Tile size is
# derived from L*H so the per-buffer footprint stays bounded on v7x.
# ----------------------------------------------------------------------------------
def _dense_tanh_weighted_pool_kernel(x_ref, pw_ref, w_ref, b_ref, out_ref):
    te, l, h = x_ref.shape
    x = x_ref[...].astype(jnp.bfloat16).reshape(te * l, h)
    w = w_ref[...]                                      # (H, H) bf16, resident
    b = b_ref[...]                                      # (1, H) f32
    hid = jnp.tanh(jnp.dot(x, w, preferred_element_type=jnp.float32) + b)
    hid = hid.reshape(te, l, h)
    pw = pw_ref[...]                                    # (TE, L) f32 pooling weights
    out_ref[...] = jnp.sum(hid * pw[:, :, None], axis=1)


def encode_pool_tokens(x, pool_w, w_bf16, b, *, max_buf_bytes=4 * 2**20):
    n, l, h = x.shape
    te = max(8, min((max_buf_bytes // (l * h * 4)) // 8 * 8, 128))
    te = min(te, _round_up(n, 8))
    n_pad = _round_up(n, te)
    if n_pad != n:
        x = jnp.pad(x, ((0, n_pad - n), (0, 0), (0, 0)))
        pool_w = jnp.pad(pool_w, ((0, n_pad - n), (0, 0)))
    est = 2 * te * l * h * 4 + h * h * 2 + h * 4 + 2 * te * h * 4 + te * l * h * 4
    out = pl.pallas_call(
        _dense_tanh_weighted_pool_kernel,
        out_shape=jax.ShapeDtypeStruct((n_pad, h), jnp.float32),
        grid_spec=pltpu.PrefetchScalarGridSpec(
            num_scalar_prefetch=0,
            grid=(n_pad // te,),
            in_specs=[
                pl.BlockSpec((te, l, h), lambda i: (i, 0, 0)),
                pl.BlockSpec((te, l), lambda i: (i, 0)),
                pl.BlockSpec((h, h), lambda i: (0, 0), pipeline_mode=pl.Buffered(1)),
                pl.BlockSpec((1, h), lambda i: (0, 0), pipeline_mode=pl.Buffered(1)),
            ],
            out_specs=pl.BlockSpec((te, h), lambda i: (i, 0)),
        ),
        compiler_params=_compiler_params(est, "parallel"),
    )(x, pool_w, w_bf16, b.reshape(1, h))
    return out[:n]


# ----------------------------------------------------------------------------------
# Kernel 1.5 (prep, one-shot): L2-normalize the pooled embeddings and cast to bf16.
# Both the miner (LpDistance normalize=True) and MSLoss (CosineSimilarity) only ever
# consume normalized embeddings, so this is hoisted out of the loss grid entirely.
# The (H, Mp) transposed candidate layout is produced once in the wrapper.
# ----------------------------------------------------------------------------------
def _normalize_bf16_kernel(e_ref, out_ref):
    e = e_ref[...]                                                     # (TR, H) f32
    en = e * lax.rsqrt(jnp.sum(e * e, axis=-1, keepdims=True) + 1e-12)
    out_ref[...] = en.astype(jnp.bfloat16)


def normalize_rows_bf16(emb, *, tile_rows):
    m_pad, h = emb.shape
    return pl.pallas_call(
        _normalize_bf16_kernel,
        out_shape=jax.ShapeDtypeStruct((m_pad, h), jnp.bfloat16),
        grid_spec=pltpu.PrefetchScalarGridSpec(
            num_scalar_prefetch=0,
            grid=(m_pad // tile_rows,),
            in_specs=[pl.BlockSpec((tile_rows, h), lambda i: (i, 0))],
            out_specs=pl.BlockSpec((tile_rows, h), lambda i: (i, 0)),
        ),
        compiler_params=pltpu.CompilerParams(dimension_semantics=("parallel",)),
    )(emb)


# ----------------------------------------------------------------------------------
# Kernel 2: TripletMarginMiner('all') + MultiSimilarityLoss, tiled over anchor rows.
# Each grid step: anchor tile (TM, H) bf16 (already normalized) x resident candidates
# (H, Mp) bf16 (normalized + transposed, single-buffered) -> (TM, Mp) cosine in f32.
# The miner is expressed as per-row cosine thresholds. Per-tile partial sums go to a
# lane-dense (8, 128) block and are reduced in the wrapper.
# ----------------------------------------------------------------------------------
def _miner_ms_loss_kernel(a_ref, cT_ref, lrow_ref, lcol_ref, valid_ref, out_ref, *,
                          tm, m_real, miner_margin, alpha, beta, base):
    a = a_ref[...]                                       # (TM, H) bf16 normalized anchors
    cT = cT_ref[...]                                     # (H, Mp) bf16 normalized candidates
    # NN matmul: contraction dim already on sublanes of cT (no per-tile transpose).
    cos = jnp.dot(a, cT, preferred_element_type=jnp.float32)          # (TM, Mp) f32

    row0 = pl.program_id(0) * tm
    row_ids = lax.broadcasted_iota(jnp.int32, (tm, 1), 0) + row0       # (TM, 1)
    col_ids = lax.broadcasted_iota(jnp.int32, cos.shape, 1)            # diagonal exclusion only
    not_diag = col_ids != row_ids

    valid = valid_ref[...] > 0                                         # (1, Mp) precomputed
    same_lbl = lcol_ref[...] == lrow_ref[...]                          # (TM, Mp)
    same = jnp.logical_and(same_lbl, valid)
    neg_pairs = jnp.logical_and(jnp.logical_not(same_lbl), valid)
    pos_pairs = jnp.logical_and(same, not_diag)

    # has_pos / has_neg from one per-row count of `same` (no float pair masks).
    n_same = jnp.sum(same.astype(jnp.float32), axis=1, keepdims=True)  # (TM, 1)
    has_pos = n_same > 1.0
    has_neg = n_same < jnp.float32(m_real)

    big = jnp.float32(1e9)
    # hardest-pair stats taken directly on cos (L2 dist is monotone decreasing in cos)
    max_neg_cos = jnp.max(jnp.where(neg_pairs, cos, -big), axis=1, keepdims=True)
    min_pos_cos = jnp.min(jnp.where(pos_pairs, cos, big), axis=1, keepdims=True)
    min_neg_d = jnp.sqrt(jnp.maximum(2.0 - 2.0 * max_neg_cos, 0.0))    # (TM, 1)
    max_pos_d = jnp.sqrt(jnp.maximum(2.0 - 2.0 * min_pos_cos, 0.0))    # (TM, 1)

    # TripletMarginMiner(margin, 'all'): keep (a,p,n) iff d(a,n) - d(a,p) <= margin.
    # Pos pair kept iff d_ap >= min_neg_d - margin  <=>  cos_ap <= 1 - 0.5*rhs_p^2
    # (always kept when rhs_p <= 0).
    rhs_p = min_neg_d - miner_margin
    thr_pos = jnp.where(rhs_p > 0.0, 1.0 - 0.5 * rhs_p * rhs_p, big)
    mined_pos = jnp.logical_and(pos_pairs,
                                jnp.logical_and(has_neg, cos <= thr_pos))
    # Neg pair kept iff d_an <= max_pos_d + margin  <=>  cos_an >= 1 - 0.5*rhs_n^2.
    rhs_n = max_pos_d + miner_margin
    thr_neg = 1.0 - 0.5 * rhs_n * rhs_n
    mined_neg = jnp.logical_and(neg_pairs,
                                jnp.logical_and(has_pos, cos >= thr_neg))

    # MultiSimilarityLoss(alpha=1, beta=60, base=0.5) on mined pairs; rows with no
    # mined pairs contribute log1p(0) = 0, matching the library's masked logsumexp.
    pos_sum = jnp.sum(jnp.where(mined_pos, jnp.exp(alpha * (base - cos)), 0.0),
                      axis=1, keepdims=True)
    neg_sum = jnp.sum(jnp.where(mined_neg, jnp.exp(beta * (cos - base)), 0.0),
                      axis=1, keepdims=True)
    per_anchor = (1.0 / alpha) * jnp.log1p(pos_sum) + (1.0 / beta) * jnp.log1p(neg_sum)
    per_anchor = jnp.where(row_ids < m_real, per_anchor, 0.0)          # zero padded rows

    out_ref[...] = jnp.broadcast_to(jnp.sum(per_anchor), out_ref.shape)


def ms_loss_with_miner(embeddings, labels, *, miner_margin=MINER_MARGIN,
                       alpha=MS_ALPHA, beta=MS_BETA, base=MS_BASE, tile_m=128):
    m, h = embeddings.shape
    tm = min(tile_m, _round_up(m, 8))
    m_pad = _round_up(m, tm)
    labels = labels.astype(jnp.int32)
    if m_pad != m:
        embeddings = jnp.pad(embeddings, ((0, m_pad - m), (0, 0)))
        labels = jnp.pad(labels, (0, m_pad - m), constant_values=-1)

    # Hoisted one-shot prep: normalize + bf16 cast; transpose once (grid-constant operand).
    en = normalize_rows_bf16(embeddings, tile_rows=tm)                 # (Mp, H) bf16
    en_t = en.T                                                        # (H, Mp) bf16

    lrow = labels.reshape(1, m_pad)
    lcol = labels.reshape(m_pad, 1)
    valid = (jnp.arange(m_pad, dtype=jnp.int32) < m).astype(jnp.int32).reshape(1, m_pad)
    num_tiles = m_pad // tm

    est = (h * m_pad * 2                     # resident candidates (bf16, single buffer)
           + 2 * tm * h * 2                  # anchor tiles (bf16, double buffered)
           + 2 * m_pad * 4 + 2 * tm * 4      # labels + validity
           + 2 * 8 * 128 * 4                 # partial-sum outputs
           + 8 * tm * m_pad * 4)             # cos + mask/exp intermediates headroom

    out = pl.pallas_call(
        functools.partial(_miner_ms_loss_kernel, tm=tm, m_real=m,
                          miner_margin=miner_margin, alpha=alpha, beta=beta, base=base),
        out_shape=jax.ShapeDtypeStruct((num_tiles, 8, 128), jnp.float32),
        grid_spec=pltpu.PrefetchScalarGridSpec(
            num_scalar_prefetch=0,
            grid=(num_tiles,),
            in_specs=[
                pl.BlockSpec((tm, h), lambda i: (i, 0)),               # anchor row tile
                pl.BlockSpec((h, m_pad), lambda i: (0, 0),             # candidates, resident
                             pipeline_mode=pl.Buffered(1)),
                pl.BlockSpec((1, m_pad), lambda i: (0, 0),
                             pipeline_mode=pl.Buffered(1)),
                pl.BlockSpec((tm, 1), lambda i: (i, 0)),
                pl.BlockSpec((1, m_pad), lambda i: (0, 0),
                             pipeline_mode=pl.Buffered(1)),
            ],
            out_specs=pl.BlockSpec((1, 8, 128), lambda i: (i, 0, 0)),
        ),
        compiler_params=_compiler_params(est, "parallel"),
    )(en, en_t, lrow, lcol, valid)

    # Mean over the 2N anchors (zeros included), reduced from per-tile partials.
    return jnp.sum(out[:, 0, 0]) / jnp.float32(m)


# ----------------------------------------------------------------------------------
# Module wrapper mirroring Sap_Metric_Learning.forward
# ----------------------------------------------------------------------------------
class SapMetricLearningPallas:
    def __init__(self, hidden, key, *, agg_mode="cls",
                 use_miner=True, miner_margin=0.2, loss="ms_loss"):
        assert loss == "ms_loss" and use_miner
        kw, kb = jax.random.split(key)
        # deterministic synthetic-encoder parameters (dense H -> H + bias);
        # weight kept as a bf16 MXU operand (autocast-style), bias/accum stay f32.
        w = (jax.random.normal(kw, (hidden, hidden), jnp.float32)
             / jnp.sqrt(jnp.float32(hidden)))
        self.w_bf16 = w.astype(jnp.bfloat16)
        self.b = 0.02 * jax.random.normal(kb, (hidden,), jnp.float32)
        self.agg_mode = agg_mode
        self.miner_margin = miner_margin

    def __call__(self, query_toks1, query_toks2, labels):
        x1 = query_toks1["inputs_embeds"]
        x2 = query_toks2["inputs_embeds"]
        if self.agg_mode == "cls":
            # Only the CLS token ever reaches the encoder matmul; both views fused
            # into a single row-tiled pallas_call over 2N rows.
            cls_rows = jnp.concatenate([x1[:, 0, :], x2[:, 0, :]], axis=0)   # (2N, H)
            query_embed = encode_cls_rows(cls_rows, self.w_bf16, self.b)
        elif self.agg_mode in ("mean_all_tok", "mean"):
            x = jnp.concatenate([x1, x2], axis=0)                            # (2N, L, H)
            n2, l, _ = x.shape
            if self.agg_mode == "mean_all_tok":
                pw = jnp.full((n2, l), 1.0 / l, jnp.float32)
            else:
                msk = jnp.concatenate([query_toks1["attention_mask"],
                                       query_toks2["attention_mask"]],
                                      axis=0).astype(jnp.float32)
                pw = msk / jnp.maximum(jnp.sum(msk, axis=-1, keepdims=True), 1.0)
            query_embed = encode_pool_tokens(x, pw, self.w_bf16, self.b)
        else:
            raise NotImplementedError(self.agg_mode)

        labels2 = jnp.concatenate([labels, labels], axis=0)                  # (2N,)
        return ms_loss_with_miner(query_embed, labels2,
                                  miner_margin=self.miner_margin)


if __name__ == "__main__":
    key = jax.random.PRNGKey(0)
    k1, k2, k3 = jax.random.split(key, 3)

    N, L, H = 4, 8, 32   # batch, seq-len, hidden
    model = SapMetricLearningPallas(H, k3, agg_mode="cls")

    query_toks1 = {
        "inputs_embeds": jax.random.normal(k1, (N, L, H), jnp.float32),
        "attention_mask": jnp.ones((N, L), jnp.float32),
    }
    query_toks2 = {
        "inputs_embeds": jax.random.normal(k2, (N, L, H), jnp.float32),
        "attention_mask": jnp.ones((N, L), jnp.float32),
    }
    labels = jnp.array([0, 1, 0, 1], jnp.int32)

    loss = model(query_toks1, query_toks2, labels)
    jax.block_until_ready(loss)
    assert jnp.isfinite(loss), "loss is not finite"
    print("KERNEL_OK")
</pallas_src>

<mosaic_0001>
module attributes {stable_mosaic.version = 11 : i64} {
  func.func @_dense_tanh_rows_kernel(%arg0: i32, %arg1: memref<8x32xf32, #tpu.memory_space<vmem>>, %arg2: memref<32x32xbf16, #tpu.memory_space<vmem>>, %arg3: memref<1x32xf32, #tpu.memory_space<vmem>>, %arg4: memref<8x32xf32, #tpu.memory_space<vmem>>) attributes {dimension_semantics = [#tpu.dimension_semantics<parallel>], iteration_bounds = array<i64: 1>, scalar_prefetch = 0 : i64, scratch_operands = 0 : i64, tpu.core_type = #tpu.core_type<tc>, window_params = [{transform_indices = @transform_0, window_bounds = array<i64: 8, 32>}, {pipeline_mode = #tpu.pipeline_mode<synchronous>, transform_indices = @transform_1, window_bounds = array<i64: 32, 32>}, {pipeline_mode = #tpu.pipeline_mode<synchronous>, transform_indices = @transform_2, window_bounds = array<i64: 1, 32>}, {transform_indices = @transform_3, window_bounds = array<i64: 8, 32>}]} {
    %c0 = arith.constant 0 : index
    %c0_0 = arith.constant 0 : index
    %0 = vector.load %arg1[%c0, %c0_0] : memref<8x32xf32, #tpu.memory_space<vmem>>, vector<8x32xf32>
    %1 = arith.truncf %0 : vector<8x32xf32> to vector<8x32xbf16>
    %c0_1 = arith.constant 0 : index
    %c0_2 = arith.constant 0 : index
    %2 = vector.load %arg2[%c0_1, %c0_2] : memref<32x32xbf16, #tpu.memory_space<vmem>>, vector<32x32xbf16>
    %c0_3 = arith.constant 0 : index
    %c0_4 = arith.constant 0 : index
    %3 = vector.load %arg3[%c0_3, %c0_4] : memref<1x32xf32, #tpu.memory_space<vmem>>, vector<1x32xf32>
    %cst = arith.constant dense<0.000000e+00> : vector<8x32xf32>
    %4 = tpu.matmul %1, %2, %cst {dimension_numbers = #tpu.dot_dimension_numbers<[1], [0], [0], [1], [0, 0, 1, 1], [], []>} : vector<8x32xbf16>, vector<32x32xbf16>, vector<8x32xf32> -> vector<8x32xf32>
    %5 = vector.broadcast %3 : vector<1x32xf32> to vector<8x32xf32>
    %6 = arith.addf %4, %5 : vector<8x32xf32>
    %7 = math.tanh %6 : vector<8x32xf32>
    %c0_5 = arith.constant 0 : index
    %c0_6 = arith.constant 0 : index
    %8 = vector.load %arg4[%c0_5, %c0_6] : memref<8x32xf32, #tpu.memory_space<vmem>>, vector<8x32xf32>
    tpu.vector_store %arg4[%c0_5, %c0_6], %7 {strides = array<i32>} : memref<8x32xf32, #tpu.memory_space<vmem>>, vector<8x32xf32>,
    return
  }
  func.func @transform_0(%arg0: i32) -> (i32, i32) {
    %c0_i32 = arith.constant 0 : i32
    %c0_i32_0 = arith.constant 0 : i32
    return %arg0, %c0_i32 : i32, i32
  }
  func.func @transform_1(%arg0: i32) -> (i32, i32) {
    %c0_i32 = arith.constant 0 : i32
    %c0_i32_0 = arith.constant 0 : i32
    %c0_i32_1 = arith.constant 0 : i32
    return %c0_i32, %c0_i32_0 : i32, i32
  }
  func.func @transform_2(%arg0: i32) -> (i32, i32) {
    %c0_i32 = arith.constant 0 : i32
    %c0_i32_0 = arith.constant 0 : i32
    %c0_i32_1 = arith.constant 0 : i32
    return %c0_i32, %c0_i32_0 : i32, i32
  }
  func.func @transform_3(%arg0: i32) -> (i32, i32) {
    %c0_i32 = arith.constant 0 : i32
    %c0_i32_0 = arith.constant 0 : i32
    return %arg0, %c0_i32 : i32, i32
  }
}

</mosaic_0001>

<bundles_post_ra>
// kernel: tpu_custom_call.1
= control target key start
LH: loop header
LB: loop body
LE: loop exit
PB: predicated region body
PF: predicated region fallthrough
CT: control target
= control target key end

     0   :  { %8 = vsyncpa [#allocation3], 0  ;;  %s239_s0 = inlined_call_operand.hbm [shape: f32[8,32], index: 0, kind: input, shape index: {}]   ;;  %s240_s1 = inlined_call_operand.hbm [shape: bf16[32,32], index: 1, kind: input, shape index: {}]   ;;  %s241_s2 = inlined_call_operand.vmem [shape: f32[1,32], index: 2, kind: input, shape index: {}]   ;;  %s242_s3 = inlined_call_operand.hbm [shape: f32[8,32], index: 3, kind: output, shape index: {}]  }
   0x1   :  { %9 = vsyncpa [#allocation6], 0 }
   0x2   :  { %10 = vsyncpa [#allocation4], 0  ;;  %s16_s14 = sshll.u32 %s239_s0, 4  ;;  %s202_s15 = smov [#allocation2]   ;;  %s17_s14 = int_to_ptr.hbm [resolvable:$true] %s16_s14 }
   0x3   :  { %s18_s16 = sshll.u32 %s202_s15, 4  ;;  %s26_s19 = sshll.u32 %s240_s1, 4  ;;  %s19_s16 = int_to_ptr.vmem [resolvable:$true] %s18_s16  ;;  %s27_s19 = int_to_ptr.hbm [resolvable:$true] %s26_s19 }
   0x4   :  { %21 = dma.hbm_to_vmem [thread:$0]  %s17_s14, 128, %s19_s16, [#allocation3]  }
   0x5   :  { %s203_s20 = smov [#allocation5]   ;;  %s204_s22 = smov 64  }
   0x6   :  { %s28_s21 = sshll.u32 %s203_s20, 4  ;;  %s205_s23 = smov 4   ;;  %s29_s21 = int_to_ptr.vmem [resolvable:$true] %s28_s21 }
   0x7   :  { %34 = dma.hbm_to_vmem [thread:$0]  %s27_s19, 256, %s29_s21, [#allocation6], %s204_s22, %s204_s22, %s205_s23  }
   0x8   :  { %196 = dma.done.wait [#allocation3], 128  }
   0x9   :  { %197 = vsyncadd [#allocation3], 4294967168 }
   0xa   :  { %198 = dma.done.wait [#allocation6], 256  }
   0xb   :  { %199 = vsyncadd [#allocation6], 4294967040  ;;  %v115_v0 = vld [vmem:[#allocation5 + $0x8] sm:$0xff]  ;;  %v114_v1 = vld [vmem:[#allocation5] sm:$0xff]  ;;  %vm68_vm0 = vcmask 261120   ;;  %s206_s24 = smov [#allocation7]  }
   0xc   :  { %78 = vmatpush.bf16.msra.mxu0 %v115_v0  ;;  %v46_v2 = vld [vmem:[#allocation2] sm:$0xff]  ;;  %s92_s25 = sshll.u32 %s206_s24, 4  ;;  %s94_s28 = sshll.u32 %s242_s3, 4  ;;  %s93_s25 = int_to_ptr.vmem [resolvable:$true] %s92_s25  ;;  %s95_s28 = int_to_ptr.hbm [resolvable:$true] %s94_s28 }
   0xd   :  { %v47_v3 = vpack.c.bf16 %v46_v2, %v46_v2  ;;  %v121_v4 = vld [vmem:[%s241_s2] ss:$0 sm:$0xff] }
  0x10   :  { %79 = vmatpush.bf16.msra.mxu0 %v114_v1 }
  0x13   :  { %113 = vmatmul.msk.bf16.vlgmr.msra.gmra.mxu0 %vm68_vm0, %v47_v3 }
  0x90   :  { %v81_v5 = vpop.f32.mrf.mxu0 }
  0x91   :  { %v82_v6 = vadd.f32 %v121_v4, %v81_v5 }
  0x93   :  { %122 = vtanh.f32 %v82_v6 }
  0x98   :  { %v83_v7 = vpop.f32.mrf.mxu0 }
  0x99   :  { %v123_v8 = vpop.eup %122 }
  0x9a   :  { %86 = vst.msk [vmem:[#allocation7] sm:$0xff] %vm68_vm0, %v123_v8 }
  0x9b   :  { %97 = dma.vmem_to_hbm [thread:$0]  %s93_s25, 128, %s95_s28, [#allocation4]  }
  0x9c   :  { %200 = dma.done.wait [#allocation4], 128  }
  0x9d   :  { %201 = vsyncadd [#allocation4], 4294967168 }
  0x9e   :  { %102 = vsyncpa [#allocation3], 1 }
  0x9f   :  { %103 = vsyncpa [#allocation6], 1 }
  0xa0   :  { %104 = vsyncpa [#allocation4], 1 }

</bundles_post_ra>
